<compile_context>
chip_gen: v6e
topology: v6e:2x2x1
jax: 0.10.0
libtpu: 0.0.40
codegen_flags: <defaults>
</compile_context>

<pallas_src>
import math
import functools

import jax
import jax.numpy as jnp
from jax.experimental import pallas as pl
from jax.experimental.pallas import tpu as pltpu


def _time_embedding_kernel(t_ref, w1_ref, bias_ref, w2_ref, o_ref, *, half, freq_scale):
    in_dim = 2 * half

    # Loop-invariant (1, in_dim) frequency / phase tables (one vreg of VALU/EUP work).
    # Lane j <  half -> phase 0     (sin(t*freqs[j]))
    # Lane j >= half -> phase pi/2  (cos(t*freqs[j-half]) == sin(t*freqs[j-half] + pi/2))
    idx = jax.lax.broadcasted_iota(jnp.int32, (1, in_dim), 1)            # (1, in_dim)
    is_cos = idx >= half
    col = jnp.where(is_cos, idx - half, idx).astype(jnp.float32)
    freqs = jnp.exp(col * freq_scale)                                     # (1, in_dim)  (EUP)
    phase = jnp.where(is_cos, jnp.float32(math.pi / 2.0), jnp.float32(0.0))

    # Sinusoidal embedding in a SINGLE transcendental pass over the (TB, in_dim) tile.
    args = t_ref[...] * freqs + phase                                     # (TB, in_dim)
    emb = jnp.sin(args)

    b1 = bias_ref[0:1, :]                                                 # (1, hidden)
    b2 = bias_ref[1:2, :]                                                 # (1, hidden)

    # Linear 1 (single K=in_dim MXU push; operands cast to the weight dtype -> bf16 path
    # runs at full MXU rate, f32 path is a no-op cast). f32 accumulation either way.
    h = jnp.dot(emb.astype(w1_ref.dtype), w1_ref[...],
                preferred_element_type=jnp.float32) + b1

    # Exact GELU (matches torch.nn.GELU default, erf-based).
    h = 0.5 * h * (1.0 + jax.lax.erf(h * (1.0 / math.sqrt(2.0))))

    # Linear 2 + bias.
    out = jnp.dot(h.astype(w2_ref.dtype), w2_ref[...],
                  preferred_element_type=jnp.float32) + b2
    o_ref[...] = out.astype(o_ref.dtype)


@functools.partial(jax.jit, static_argnames=("theta", "mxu_bf16"))
def time_embedding(x, w1, b1, w2, b2, *, theta=10000, mxu_bf16=False):
    """x: (B,) float time steps. w1: (in_dim, hidden), b1: (hidden,),
    w2: (hidden, hidden), b2: (hidden,). Returns (B, hidden) float32.

    mxu_bf16=True casts W1/W2 (and the MXU lhs operands) to bf16 with f32 accumulation:
    full-rate MXU + half the resident-weight bytes, at the cost of ~bf16-level drift from
    exact torch-f32 parity."""
    B = x.shape[0]
    in_dim, hidden = w1.shape
    half = in_dim // 2
    # max(..., 1) guards the in_dim == 2 corner case (torch itself divides by zero there).
    freq_scale = -math.log(theta) / max(half - 1, 1)

    t = x.astype(jnp.float32)[:, None]                       # (B, 1)
    biases = jnp.stack([b1, b2], axis=0).astype(jnp.float32)  # (2, hidden), one DMA

    if mxu_bf16:
        w1 = w1.astype(jnp.bfloat16)
        w2 = w2.astype(jnp.bfloat16)

    # Batch tile:
    #  - tiny B: one tile (avoid the ~0.35us/step grid overhead),
    #  - mid B : exactly 2 balanced tiles so v7x's two TensorCores both get work,
    #  - big B : 512-row tiles, resident weights amortized across the whole grid.
    if B <= 256:
        TB = B
    elif B <= 1024:
        TB = ((B + 1) // 2 + 7) // 8 * 8   # round_up(cdiv(B, 2), 8)
    else:
        TB = 512
    grid = (pl.cdiv(B, TB),)

    # Raise the scoped VMEM limit only when the (double-buffered) resident weights need it
    # (large hidden on v5e's 16 MiB / v7x's 32 MiB defaults). Nothing is set at small shapes.
    wbytes = jnp.dtype(w1.dtype).itemsize
    vmem_need = (2 * (TB * 4 + in_dim * hidden * wbytes + 2 * hidden * 4
                      + hidden * hidden * wbytes)
                 + 2 * TB * hidden * 4                      # double-buffered output tile
                 + 4 * TB * max(in_dim, hidden) * 4)        # intermediate headroom
    vmem_limit = None
    if vmem_need > 32 * 1024 * 1024:
        vmem_limit = min(vmem_need, 64 * 1024 * 1024)

    kernel = functools.partial(_time_embedding_kernel, half=half, freq_scale=freq_scale)

    return pl.pallas_call(
        kernel,
        out_shape=jax.ShapeDtypeStruct((B, hidden), jnp.float32),
        grid=grid,
        in_specs=[
            pl.BlockSpec((TB, 1), lambda i: (i, 0)),            # t: tiled over batch
            pl.BlockSpec((in_dim, hidden), lambda i: (0, 0)),   # W1: resident
            pl.BlockSpec((2, hidden), lambda i: (0, 0)),        # [b1; b2]: resident
            pl.BlockSpec((hidden, hidden), lambda i: (0, 0)),   # W2: resident
        ],
        out_specs=pl.BlockSpec((TB, hidden), lambda i: (i, 0)),
        compiler_params=pltpu.CompilerParams(
            dimension_semantics=("parallel",),                  # lets v7x use both TCs
            vmem_limit_bytes=vmem_limit),
    )(t, w1, biases, w2)


def _reference(x, w1, b1, w2, b2, theta=10000):
    in_dim = w1.shape[0]
    half = in_dim // 2
    emb = math.log(theta) / (half - 1)
    freqs = jnp.exp(jnp.arange(half, dtype=jnp.float32) * -emb)
    args = x[:, None] * freqs[None, :]
    emb = jnp.concatenate([jnp.sin(args), jnp.cos(args)], axis=-1)
    h = emb @ w1 + b1
    h = jax.nn.gelu(h, approximate=False)
    return h @ w2 + b2


if __name__ == "__main__":
    # Small shapes consistent with the module: in_dim=32, hidden=in_dim*4=128, batch=8.
    in_dim = 32
    hidden = in_dim * 4
    B = 8

    key = jax.random.PRNGKey(0)
    kx, k1, k2, k3, k4 = jax.random.split(key, 5)

    # Deterministic synthetic parameters (nn.Linear-like fan-in scaling).
    x = jax.random.uniform(kx, (B,), jnp.float32, minval=0.0, maxval=1000.0)
    w1 = jax.random.normal(k1, (in_dim, hidden), jnp.float32) / math.sqrt(in_dim)
    b1 = jax.random.normal(k2, (hidden,), jnp.float32) * 0.01
    w2 = jax.random.normal(k3, (hidden, hidden), jnp.float32) / math.sqrt(hidden)
    b2 = jax.random.normal(k4, (hidden,), jnp.float32) * 0.01

    ref = _reference(x, w1, b1, w2, b2)

    # Default f32 path (exact torch parity up to the sin(x+pi/2) phase identity, which
    # shifts large-timestep lanes by ~ulp(t*freq); 5e-4 tolerance covers it comfortably).
    out = time_embedding(x, w1, b1, w2, b2)
    out = jax.block_until_ready(out)
    assert out.shape == (B, hidden), out.shape
    assert jnp.allclose(out, ref, atol=5e-4, rtol=5e-4), float(jnp.max(jnp.abs(out - ref)))

    # Optional bf16-MXU path: sanity check only (bf16-level drift expected).
    out_bf16 = jax.block_until_ready(time_embedding(x, w1, b1, w2, b2, mxu_bf16=True))
    assert out_bf16.shape == (B, hidden)
    assert bool(jnp.all(jnp.isfinite(out_bf16)))
    assert float(jnp.max(jnp.abs(out_bf16 - ref))) < 0.25

    print("KERNEL_OK")
</pallas_src>

<mosaic_0001>
module attributes {stable_mosaic.version = 11 : i64} {
  func.func @_time_embedding_kernel(%arg0: i32, %arg1: memref<8x1xf32, #tpu.memory_space<vmem>>, %arg2: memref<32x128xf32, #tpu.memory_space<vmem>>, %arg3: memref<2x128xf32, #tpu.memory_space<vmem>>, %arg4: memref<128x128xf32, #tpu.memory_space<vmem>>, %arg5: memref<8x128xf32, #tpu.memory_space<vmem>>) attributes {dimension_semantics = [#tpu.dimension_semantics<parallel>], iteration_bounds = array<i64: 1>, scalar_prefetch = 0 : i64, scratch_operands = 0 : i64, tpu.core_type = #tpu.core_type<tc>, window_params = [{transform_indices = @transform_0, window_bounds = array<i64: 8, 1>}, {pipeline_mode = #tpu.pipeline_mode<synchronous>, transform_indices = @transform_1, window_bounds = array<i64: 32, 128>}, {pipeline_mode = #tpu.pipeline_mode<synchronous>, transform_indices = @transform_2, window_bounds = array<i64: 2, 128>}, {pipeline_mode = #tpu.pipeline_mode<synchronous>, transform_indices = @transform_3, window_bounds = array<i64: 128, 128>}, {transform_indices = @transform_4, window_bounds = array<i64: 8, 128>}]} {
    %0 = tpu.iota {dimensions = array<i32: 1>} : vector<1x32xi32>
    %c16_i32 = arith.constant 16 : i32
    %1 = vector.broadcast %c16_i32 : i32 to vector<1x32xi32>
    %2 = arith.cmpi sge, %0, %1 : vector<1x32xi32>
    %c16_i32_0 = arith.constant 16 : i32
    %3 = vector.broadcast %c16_i32_0 : i32 to vector<1x32xi32>
    %4 = arith.subi %0, %3 : vector<1x32xi32>
    %5 = arith.select %2, %4, %0 : vector<1x32xi1>, vector<1x32xi32>
    %6 = arith.sitofp %5 : vector<1x32xi32> to vector<1x32xf32>
    %cst = arith.constant -0.614022672 : f32
    %7 = vector.broadcast %cst : f32 to vector<1x32xf32>
    %8 = arith.mulf %6, %7 : vector<1x32xf32>
    %9 = math.exp %8 : vector<1x32xf32>
    %cst_1 = arith.constant 1.57079637 : f32
    %cst_2 = arith.constant 0.000000e+00 : f32
    %10 = vector.broadcast %cst_1 : f32 to vector<1x32xf32>
    %11 = vector.broadcast %cst_2 : f32 to vector<1x32xf32>
    %12 = arith.select %2, %10, %11 : vector<1x32xi1>, vector<1x32xf32>
    %c0 = arith.constant 0 : index
    %c0_3 = arith.constant 0 : index
    %13 = vector.load %arg1[%c0, %c0_3] : memref<8x1xf32, #tpu.memory_space<vmem>>, vector<8x1xf32>
    %14 = vector.broadcast %13 : vector<8x1xf32> to vector<8x32xf32>
    %15 = vector.broadcast %9 : vector<1x32xf32> to vector<8x32xf32>
    %16 = arith.mulf %14, %15 : vector<8x32xf32>
    %17 = vector.broadcast %12 : vector<1x32xf32> to vector<8x32xf32>
    %18 = arith.addf %16, %17 : vector<8x32xf32>
    %19 = math.sin %18 : vector<8x32xf32>
    %c0_4 = arith.constant 0 : index
    %c0_5 = arith.constant 0 : index
    %20 = vector.load %arg3[%c0_4, %c0_5] : memref<2x128xf32, #tpu.memory_space<vmem>>, vector<1x128xf32>
    %c1 = arith.constant 1 : index
    %c0_6 = arith.constant 0 : index
    %21 = vector.load %arg3[%c1, %c0_6] : memref<2x128xf32, #tpu.memory_space<vmem>>, vector<1x128xf32>
    %c0_7 = arith.constant 0 : index
    %c0_8 = arith.constant 0 : index
    %22 = vector.load %arg2[%c0_7, %c0_8] : memref<32x128xf32, #tpu.memory_space<vmem>>, vector<32x128xf32>
    %cst_9 = arith.constant dense<0.000000e+00> : vector<8x128xf32>
    %23 = tpu.matmul %19, %22, %cst_9 {dimension_numbers = #tpu.dot_dimension_numbers<[1], [0], [0], [1], [0, 0, 1, 1], [], []>} : vector<8x32xf32>, vector<32x128xf32>, vector<8x128xf32> -> vector<8x128xf32>
    %24 = vector.broadcast %20 : vector<1x128xf32> to vector<8x128xf32>
    %25 = arith.addf %23, %24 : vector<8x128xf32>
    %cst_10 = arith.constant 5.000000e-01 : f32
    %26 = vector.broadcast %cst_10 : f32 to vector<8x128xf32>
    %27 = arith.mulf %26, %25 : vector<8x128xf32>
    %cst_11 = arith.constant 0.707106769 : f32
    %28 = vector.broadcast %cst_11 : f32 to vector<8x128xf32>
    %29 = arith.mulf %25, %28 : vector<8x128xf32>
    %30 = math.erf %29 : vector<8x128xf32>
    %cst_12 = arith.constant 1.000000e+00 : f32
    %31 = vector.broadcast %cst_12 : f32 to vector<8x128xf32>
    %32 = arith.addf %31, %30 : vector<8x128xf32>
    %33 = arith.mulf %27, %32 : vector<8x128xf32>
    %c0_13 = arith.constant 0 : index
    %c0_14 = arith.constant 0 : index
    %34 = vector.load %arg4[%c0_13, %c0_14] : memref<128x128xf32, #tpu.memory_space<vmem>>, vector<128x128xf32>
    %cst_15 = arith.constant dense<0.000000e+00> : vector<8x128xf32>
    %35 = tpu.matmul %33, %34, %cst_15 {dimension_numbers = #tpu.dot_dimension_numbers<[1], [0], [0], [1], [0, 0, 1, 1], [], []>} : vector<8x128xf32>, vector<128x128xf32>, vector<8x128xf32> -> vector<8x128xf32>
    %36 = vector.broadcast %21 : vector<1x128xf32> to vector<8x128xf32>
    %37 = arith.addf %35, %36 : vector<8x128xf32>
    %c0_16 = arith.constant 0 : index
    %c0_17 = arith.constant 0 : index
    %38 = vector.load %arg5[%c0_16, %c0_17] : memref<8x128xf32, #tpu.memory_space<vmem>>, vector<8x128xf32>
    tpu.vector_store %arg5[%c0_16, %c0_17], %37 {strides = array<i32>} : memref<8x128xf32, #tpu.memory_space<vmem>>, vector<8x128xf32>,
    return
  }
  func.func @transform_0(%arg0: i32) -> (i32, i32) {
    %c0_i32 = arith.constant 0 : i32
    %c0_i32_0 = arith.constant 0 : i32
    return %arg0, %c0_i32 : i32, i32
  }
  func.func @transform_1(%arg0: i32) -> (i32, i32) {
    %c0_i32 = arith.constant 0 : i32
    %c0_i32_0 = arith.constant 0 : i32
    %c0_i32_1 = arith.constant 0 : i32
    return %c0_i32, %c0_i32_0 : i32, i32
  }
  func.func @transform_2(%arg0: i32) -> (i32, i32) {
    %c0_i32 = arith.constant 0 : i32
    %c0_i32_0 = arith.constant 0 : i32
    %c0_i32_1 = arith.constant 0 : i32
    return %c0_i32, %c0_i32_0 : i32, i32
  }
  func.func @transform_3(%arg0: i32) -> (i32, i32) {
    %c0_i32 = arith.constant 0 : i32
    %c0_i32_0 = arith.constant 0 : i32
    %c0_i32_1 = arith.constant 0 : i32
    return %c0_i32, %c0_i32_0 : i32, i32
  }
  func.func @transform_4(%arg0: i32) -> (i32, i32) {
    %c0_i32 = arith.constant 0 : i32
    %c0_i32_0 = arith.constant 0 : i32
    return %arg0, %c0_i32 : i32, i32
  }
}

</mosaic_0001>

<bundles_post_ra>
// kernel: time_embedding.1
= control target key start
LH: loop header
LB: loop body
LE: loop exit
PB: predicated region body
PF: predicated region fallthrough
CT: control target
= control target key end

     0   :  { %9 = vsyncpa [#allocation3], 0  ;;  %s634_s0 = inlined_call_operand.vmem [shape: f32[8,1], index: 0, kind: input, shape index: {}]   ;;  %s635_s1 = inlined_call_operand.hbm [shape: f32[32,128], index: 1, kind: input, shape index: {}]   ;;  %s636_s2 = inlined_call_operand.vmem [shape: f32[2,128], index: 2, kind: input, shape index: {}]   ;;  %s637_s3 = inlined_call_operand.hbm [shape: f32[128,128], index: 3, kind: input, shape index: {}]   ;;  %s638_s4 = inlined_call_operand.hbm [shape: f32[8,128], index: 4, kind: output, shape index: {}]  }
   0x1   :  { %10 = vsyncpa [#allocation6], 0 }
   0x2   :  { %11 = vsyncpa [#allocation4], 0  ;;  %s533_s15 = smov [#allocation2]  }
   0x3   :  { %s19_s16 = sshll.u32 %s533_s15, 4  ;;  %s20_s16 = int_to_ptr.vmem [resolvable:$true] %s19_s16 }
   0x4   :  { %s475_s17 = scalar_lea.vmem %s20_s16, 512  ;;  %p480_p1 = scmp.lt.s32.totalorder %s20_s16, %s20_s16 }
   0x5   :  { %p476_p0 = scmp.ne.s32.totalorder %s20_s16, %s475_s17  ;;  %p481_p2 = scmp.lt.s32.totalorder %s475_s17, %s475_s17 }
   0x7   :  { %p482_p3 = por %p481_p2, %p480_p1 }
   0x9   :  { %p483_p4 = pnand %p482_p3, %p476_p0 }
   0xb   :  { %486 = shalt.err (!%p483_p4)
}
   0xc   :  { %s534_s18 = smov 128   ;;  %s535_s19 = smov 8  }
   0xd   :  { %25 = dma.hbm_to_vmem [thread:$0]  %s635_s1, 512, %s20_s16, [#allocation3], %s534_s18, %s534_s18, %s535_s19  }
   0xe   :  { %s536_s22 = smov [#allocation5]  }
   0xf   :  { %s33_s23 = sshll.u32 %s536_s22, 4  ;;  %s34_s23 = int_to_ptr.vmem [resolvable:$true] %s33_s23 }
  0x10   :  { %s495_s24 = scalar_lea.vmem %s34_s23, 2048  ;;  %p500_p6 = scmp.lt.s32.totalorder %s34_s23, %s34_s23 }
  0x11   :  { %p496_p5 = scmp.ne.s32.totalorder %s34_s23, %s495_s24  ;;  %p501_p7 = scmp.lt.s32.totalorder %s495_s24, %s495_s24 }
  0x13   :  { %p502_p8 = por %p501_p7, %p500_p6 }
  0x15   :  { %p503_p9 = pnand %p502_p8, %p496_p5 }
  0x17   :  { %506 = shalt.err (!%p503_p9)
}
  0x18   :  { %39 = dma.hbm_to_vmem [thread:$0]  %s637_s3, 2048, %s34_s23, [#allocation6], %s534_s18, %s534_s18, %s535_s19  }
  0x19   :  { %527 = dma.done.wait [#allocation3], 512  }
  0x1a   :  { %528 = vsyncadd [#allocation3], 4294966784 }
  0x1b   :  { %529 = dma.done.wait [#allocation6], 2048  }
  0x1c   :  { %530 = vsyncadd [#allocation6], 4294965248  ;;  %v537_v0 = vmov 0   ;;  %v538_v1 = vmov 0.0   ;;  %v56_v2 = vld [vmem:[%s634_s0] sm:$0xff]  ;;  %v173_v3 = vld [vmem:[#allocation2 + $0x18] sm:$0xff]  ;;  %v46_v7 = vlaneseq }
  0x1d   :  { %458 = vset.pattern.permute.xlu0 %v537_v0  ;;  %394 = vmatprep.subr.mxu0 %v538_v1  ;;  %v172_v4 = vld [vmem:[#allocation2 + $0x10] sm:$0xff]  ;;  %vm539_vm0 = vmmov 0   ;;  %v171_v5 = vld [vmem:[#allocation2 + $0x8] sm:$0xff]  ;;  %v170_v6 = vld [vmem:[#allocation2] sm:$0xff]  ;;  %v540_v34 = vmov 2102212464  }
  0x1e   :  { %405 = vmatprep.subr.mxu1 %v538_v1  ;;  %59 = vperm.xlu0 %458, %v56_v2   ;;  %v272_v8 = vld [vmem:[#allocation5 + $0x78] sm:$0xff]  ;;  %v271_v9 = vld [vmem:[#allocation5 + $0x70] sm:$0xff]  ;;  %v47_v10 = vand.u32 127, %v46_v7  ;;  %v270_v11 = vld [vmem:[#allocation5 + $0x68] sm:$0xff]  ;;  %v541_v36 = vmov 920167782  }
  0x1f   :  { %395 = vmatpush3.msra.mxu0 %v173_v3  ;;  %402 = vmatprep.mubr.msk.f32.mxu0 %vm539_vm0, %v538_v1  ;;  %v269_v12 = vld [vmem:[#allocation5 + $0x60] sm:$0xff]  ;;  %v542_v40 = vmov 1326507024   ;;  %v543_v42 = vmov 683565275   ;;  %vm178_vm14 = vcmask 261120  }
  0x20   :  { %396 = vmatprep.subr.mxu0 %v538_v1  ;;  %437 = vmatprep.mubr.msk.f32.mxu1 %vm539_vm0, %v538_v1  ;;  %v364_v13 = vadd.s32 4294967280, %v47_v10  ;;  %vm48_vm1 = vcmp.ge.s32.totalorder %v47_v10, 16  ;;  %v544_v44 = vmov 2475754826   ;;  %v545_v47 = vmov 2131351028  }
  0x21   :  { %397 = vmatpush3.msra.mxu0 %v172_v4  ;;  %406 = vmatpush3.msra.mxu1 %v272_v8  ;;  %v55_v19 = vsel %vm48_vm1, 1.5707964, %v538_v1  ;;  %s546_s30 = smov [#allocation7]  }
  0x22   :  { %398 = vmatprep.subr.mxu0 %v538_v1  ;;  %407 = vmatprep.subr.mxu1 %v538_v1  ;;  %v50_v14 = vsel %vm48_vm1, %v364_v13, %v47_v10  ;;  %s354_s5 = sshll.u32 %s546_s30, 4  ;;  %s355_s5 = int_to_ptr.vmem [resolvable:$true] %s354_s5 }
  0x23   :  { %399 = vmatpush3.msra.mxu0 %v171_v5  ;;  %408 = vmatpush3.msra.mxu1 %v271_v9  ;;  %v51_v15 = vcvt.s32.f32 %v50_v14  ;;  %s507_s6 = scalar_lea.vmem %s355_s5, 128  ;;  %p512_p11 = scmp.lt.s32.totalorder %s355_s5, %s355_s5 }
  0x24   :  { %400 = vmatprep.subr.mxu0 %v538_v1  ;;  %409 = vmatprep.subr.mxu1 %v538_v1  ;;  %p508_p10 = scmp.ne.s32.totalorder %s355_s5, %s507_s6  ;;  %p513_p12 = scmp.lt.s32.totalorder %s507_s6, %s507_s6 }
  0x25   :  { %401 = vmatpush3.msra.mxu0 %v170_v6  ;;  %410 = vmatpush3.msra.mxu1 %v270_v11  ;;  %v52_v16 = vmul.f32 -0.6140227, %v51_v15 }
  0x26   :  { %411 = vmatprep.subr.mxu1 %v538_v1  ;;  %p514_p13 = por %p513_p12, %p512_p11 }
  0x27   :  { %412 = vmatpush3.msra.mxu1 %v269_v12  ;;  %v53_v17 = vmul.f32 1.442695, %v52_v16 }
  0x28   :  { %413 = vmatprep.subr.mxu1 %v538_v1  ;;  %p515_p0 = pnand %p514_p13, %p508_p10 }
  0x29   :  { %459 = vpow2.f32 %v53_v17 }
  0x36   :  { %v460_v18 = vpop.eup %459 }
  0x99   :  { %v60_v20 = vpop.permute.xlu0 %59 }
  0x9a   :  { %v62_v21 = vmul.f32 %v460_v18, %v60_v20 }
  0x9c   :  { %v593_v22 = vadd.f32 %v62_v21, %v55_v19 }
  0x9e   :  { %v67_v23 = vand.u32 2139095040, %v593_v22  ;;  %v64_v24 = vand.u32 2147483647, %v593_v22  ;;  %vm66_vm9 = vcmp.lt.s32.totalorder %v593_v22, 0  ;;  %vm156_vm15 = vweird.f32 %v593_v22 }
  0xa0   :  { %v68_v25 = vshrl.u32 %v67_v23, 23  ;;  %v71_v27 = vand.u32 8388607, %v64_v24  ;;  %vm65_vm10 = vcmp.le.f32.partialorder %v64_v24, 0.7853982 }
  0xa2   :  { %v365_v26 = vadd.s32 4294967169, %v68_v25  ;;  %v72_v30 = vor.u32 8388608, %v71_v27 }
  0xa4   :  { %v74_v28 = vadd.s32 1, %v365_v26  ;;  %v112_v38 = vshll.u32 %v72_v30, 8 }
  0xa6   :  { %vm75_vm2 = vcmp.gt.s32.totalorder %v74_v28, 0 }
  0xa7   :  { %v76_v29 = vsel %vm75_vm2, %v74_v28, 0 }
  0xa8   :  { %v78_v31 = vand.u32 31, %v76_v29  ;;  %v77_v32 = vshrl.u32 %v76_v29, 5 }
  0xaa   :  { %v79_v33 = vsub.s32 32, %v78_v31  ;;  %v90_v35 = vshll.u32 %v540_v34, %v78_v31  ;;  %v93_v37 = vshll.u32 %v541_v36, %v78_v31  ;;  %v81_v43 = vshll.u32 %v543_v42, %v78_v31 }
  0xab   :  { %v84_v46 = vshll.u32 %v544_v44, %v78_v31  ;;  %v87_v49 = vshll.u32 %v545_v47, %v78_v31  ;;  %vm99_vm3 = vcmp.lt.s32.totalorder %v77_v32, 4  ;;  %vm96_vm4 = vcmp.lt.s32.totalorder %v77_v32, 1 }
  0xac   :  { %v91_v39 = vshrl.u32 %v541_v36, %v79_v33  ;;  %v94_v41 = vshrl.u32 %v542_v40, %v79_v33  ;;  %v82_v45 = vshrl.u32 %v544_v44, %v79_v33  ;;  %v85_v48 = vshrl.u32 %v545_v47, %v79_v33 }
  0xad   :  { %v88_v50 = vshrl.u32 %v540_v34, %v79_v33  ;;  %v80_v54 = vshrl.u32 %v543_v42, %v79_v33  ;;  %vm97_vm5 = vcmp.lt.s32.totalorder %v77_v32, 2  ;;  %vm98_vm6 = vcmp.lt.s32.totalorder %v77_v32, 3 }
  0xae   :  { %v92_v51 = vor.u32 %v91_v39, %v90_v35  ;;  %v95_v52 = vor.u32 %v94_v41, %v93_v37  ;;  %v83_v53 = vor.u32 %v82_v45, %v81_v43  ;;  %v86_v55 = vor.u32 %v85_v48, %v84_v46 }
  0xaf   :  { %v89_v56 = vor.u32 %v88_v50, %v87_v49 }
  0xb0   :  { %v105_v57 = vsel %vm99_vm3, %v92_v51, 920167782  ;;  %v109_v58 = vsel %vm99_vm3, %v95_v52, 1326507024  ;;  %v104_v60 = vsel %vm96_vm4, %v83_v53, %v86_v55  ;;  %v100_v63 = vsel %vm96_vm4, %v80_v54, %v83_v53  ;;  %v268_v52 = vld [vmem:[#allocation5 + $0x58] sm:$0xff]  ;;  %v267_v53 = vld [vmem:[#allocation5 + $0x50] sm:$0xff] }
  0xb1   :  { %v101_v59 = vsel %vm99_vm3, %v89_v56, 2102212464  ;;  %v106_v61 = vsel %vm98_vm6, %v89_v56, %v105_v57  ;;  %v108_v62 = vsel %vm96_vm4, %v86_v55, %v89_v56  ;;  %v110_v3 = vsel %vm98_vm6, %v92_v51, %v109_v58  ;;  %414 = vmatpush3.msra.mxu1 %v268_v52  ;;  %v266_v54 = vld [vmem:[#allocation5 + $0x48] sm:$0xff]  ;;  %v264_v56 = vld [vmem:[#allocation5 + $0x38] sm:$0xff]  ;;  %v261_v58 = vld [vmem:[#allocation5 + $0x20] sm:$0xff] }
  0xb2   :  { %v102_v0 = vsel %vm98_vm6, %v86_v55, %v101_v59  ;;  %v107_v2 = vsel %vm97_vm5, %v104_v60, %v106_v61  ;;  %v111_v4 = vsel %vm97_vm5, %v108_v62, %v110_v3  ;;  %415 = vmatprep.subr.mxu1 %v538_v1  ;;  %v265_v55 = vld [vmem:[#allocation5 + $0x40] sm:$0xff]  ;;  %v262_v57 = vld [vmem:[#allocation5 + $0x28] sm:$0xff]  ;;  %v260_v59 = vld [vmem:[#allocation5 + $0x18] sm:$0xff] }
  0xb3   :  { %v599_v5 = vmul.u32.u64.low %v112_v38, %v107_v2  ;;  %v600_v6 = vmul.u32.u64.high %v112_v38, %v107_v2, %v599_v5  ;;  %v602_v7 = vmul.u32.u64.low %v112_v38, %v111_v4  ;;  %v603_v8 = vmul.u32.u64.high %v112_v38, %v111_v4, %v602_v7  ;;  %416 = vmatpush3.msra.mxu1 %v267_v53  ;;  %v259_v60 = vld [vmem:[#allocation5 + $0x10] sm:$0xff]  ;;  %v258_v61 = vld [vmem:[#allocation5 + $0x8] sm:$0xff]  ;;  %v257_v62 = vld [vmem:[#allocation5] sm:$0xff] }
  0xb4   :  { %v103_v9 = vsel %vm97_vm5, %v100_v63, %v102_v0  ;;  %417 = vmatprep.subr.mxu1 %v538_v1  ;;  %v369_v63 = vld [vmem:[%s636_s2] ss:$0 sm:$0xff] }
  0xb5   :  { %v122_v10 = vadd.s32 1, %v600_v6  ;;  %v119_v11 = vmul.u32 %v112_v38, %v103_v9  ;;  %vm121_vm7 = vc.u32 %v603_v8, %v599_v5  ;;  %v120_v25 = vadd.s32 %v599_v5, %v603_v8  ;;  %418 = vmatpush3.msra.mxu1 %v266_v54  ;;  %v371_v9 = vld [vmem:[%s636_s2 + $0x1] ss:$0 sm:$0xff] }
  0xb6   :  { %419 = vmatprep.subr.mxu1 %v538_v1 }
  0xb7   :  { %v123_v12 = vsel %vm121_vm7, %v122_v10, %v600_v6  ;;  %420 = vmatpush3.msra.mxu1 %v265_v55 }
  0xb8   :  { %v124_v13 = vadd.s32 %v123_v12, %v119_v11  ;;  %421 = vmatprep.subr.mxu1 %v538_v1 }
  0xb9   :  { %422 = vmatpush3.msra.mxu1 %v264_v56 }
  0xba   :  { %v125_v14 = vadd.s32 536870912, %v124_v13  ;;  %423 = vmatprep.subr.mxu1 %v538_v1 }
  0xbc   :  { %v126_v15 = vshrl.u32 %v125_v14, 30 }
  0xbe   :  { %v127_v16 = vshll.u32 %v126_v15, 30  ;;  %v150_v38 = vsub.s32 4, %v126_v15 }
  0xc0   :  { %v128_v17 = vsub.s32 %v124_v13, %v127_v16  ;;  %v151_v41 = vsel %vm66_vm9, %v150_v38, %v126_v15 }
  0xc1   :  { %v153_v42 = vsel %vm65_vm10, 0, %v151_v41 }
  0xc2   :  { %v130_v18 = vsub.s32 0, %v128_v17  ;;  %v157_v43 = vadd.s32 3, %v153_v42 }
  0xc4   :  { %v366_v19 = vmin.u32 %v130_v18, %v128_v17  ;;  %v158_v44 = vand.u32 3, %v157_v43 }
  0xc6   :  { %v132_v20 = vclz %v366_v19  ;;  %vm163_vm11 = vcmp.eq.s32.totalorder %v158_v44, 2  ;;  %vm160_vm12 = vcmp.eq.s32.totalorder %v158_v44, 0  ;;  %vm159_vm13 = vcmp.lt.s32.totalorder %v158_v44, 2 }
  0xc8   :  { %v367_v21 = vadd.s32 4294967294, %v132_v20 }
  0xca   :  { %vm368_vm8 = vcmp.lt.s32.totalorder %v367_v21, 0 }
  0xcb   :  { %v135_v23 = vsel %vm368_vm8, 0, %v367_v21 }
  0xcc   :  { %v136_v26 = vsub.s32 32, %v135_v23  ;;  %v140_v27 = vsub.s32 4294967266, %v135_v23  ;;  %v137_v28 = vshll.u32 %v128_v17, %v135_v23 }
  0xce   :  { %v138_v29 = vshrl.u32 %v120_v25, %v136_v26  ;;  %v141_v30 = vadd.s32 127, %v140_v27 }
  0xd0   :  { %v139_v31 = vor.u32 %v138_v29, %v137_v28  ;;  %v142_v32 = vshll.u32 %v141_v30, 23 }
  0xd2   :  { %v143_v33 = vor.u32 4788187, %v142_v32  ;;  %v146_v35 = vcvt.s32.f32 %v139_v31 }
  0xd4   :  { %v144_v34 = vand.u32 2147483647, %v143_v33 }
  0xd6   :  { %v147_v36 = vmul.f32 %v146_v35, %v144_v34 }
  0xd8   :  { %v148_v37 = vxor.u32 2147483648, %v147_v36 }
  0xda   :  { %v149_v39 = vsel %vm66_vm9, %v148_v37, %v147_v36 }
  0xdb   :  { %v152_v40 = vsel %vm65_vm10, %v593_v22, %v149_v39  ;;  %v263_v22 = vld [vmem:[#allocation5 + $0x30] sm:$0xff] }
  0xdc   :  { %461 = vcosq.f32 %v152_v40  ;;  %424 = vmatpush3.msra.mxu1 %v263_v22 }
  0xdd   :  { %463 = vsinq.f32 %v152_v40  ;;  %425 = vmatprep.subr.mxu1 %v538_v1 }
  0xde   :  { %426 = vmatpush3.msra.mxu1 %v262_v57 }
  0xdf   :  { %427 = vmatprep.subr.mxu1 %v538_v1 }
  0xe0   :  { %428 = vmatpush3.msra.mxu1 %v261_v58 }
  0xe1   :  { %429 = vmatprep.subr.mxu1 %v538_v1 }
  0xe2   :  { %430 = vmatpush3.msra.mxu1 %v260_v59 }
  0xe3   :  { %431 = vmatprep.subr.mxu1 %v538_v1 }
  0xe4   :  { %432 = vmatpush3.msra.mxu1 %v259_v60 }
  0xe5   :  { %433 = vmatprep.subr.mxu1 %v538_v1 }
  0xe6   :  { %434 = vmatpush3.msra.mxu1 %v258_v61 }
  0xe7   :  { %435 = vmatprep.subr.mxu1 %v538_v1 }
  0xe8   :  { %436 = vmatpush3.msra.mxu1 %v257_v62 }
  0xe9   :  { %v462_v45 = vpop.eup %461 }
  0xea   :  { %v464_v46 = vpop.eup %463  ;;  %v164_v47 = vxor.u32 2147483648, %v462_v45 }
  0xeb   :  { %v161_v48 = vxor.u32 2147483648, %v464_v46 }
  0xec   :  { %v165_v49 = vsel %vm163_vm11, %v164_v47, %v464_v46 }
  0xed   :  { %v162_v50 = vsel %vm160_vm12, %v462_v45, %v161_v48 }
  0xee   :  { %v166_v24 = vsel %vm159_vm13, %v162_v50, %v165_v49 }
  0xef   :  { %v167_v51 = vsel %vm156_vm15, nan, %v166_v24 }
  0xf0   :  { %403 = vmatmul.mubr.msk.f32.vlgmr.msra.gmra.mxu0 %vm178_vm14, %v167_v51 }
 0x1b0   :  { %v248_v0 = vpop.f32.mrf.mxu0 }
 0x1b1   :  { %v249_v2 = vadd.f32 %v369_v63, %v248_v0 }
 0x1b2   :  { %v404_v3 = vpop.f32.mrf.mxu0 }
 0x1b3   :  { %v253_v4 = vmul.f32 0.70710677, %v249_v2  ;;  %v252_v6 = vmul.f32 0.5, %v249_v2 }
 0x1b5   :  { %465 = verf.f32 %v253_v4 }
 0x1c2   :  { %v466_v5 = vpop.eup %465 }
 0x1c3   :  { %v255_v7 = vadd.f32 1.0, %v466_v5 }
 0x1c5   :  { %v256_v8 = vmul.f32 %v255_v7, %v252_v6 }
 0x1c7   :  { %438 = vmatmul.mubr.f32.vlgmr.msra.gmra.mxu1 %v256_v8 }
 0x287   :  { %v343_v1 = vpop.f32.mrf.mxu1 }
 0x288   :  { %v344_v10 = vadd.f32 %v371_v9, %v343_v1 }
 0x289   :  { %v439_v11 = vpop.f32.mrf.mxu1 }
 0x28a   :  { %347 = vst [vmem:[#allocation7] sm:$0xff] %v344_v10 }
 0x28b   :  { %518 = shalt.err (!%p515_p0)
}
 0x28c   :  { %357 = dma.vmem_to_hbm [thread:$0]  %s355_s5, 128, %s638_s4, [#allocation4]  }
 0x28d   :  { %531 = dma.done.wait [#allocation4], 128  }
 0x28e   :  { %532 = vsyncadd [#allocation4], 4294967168 }
 0x28f   :  { %361 = vsyncpa [#allocation3], 1 }
 0x290   :  { %362 = vsyncpa [#allocation6], 1 }
 0x291   :  { %363 = vsyncpa [#allocation4], 1 }

</bundles_post_ra>
